<compile_context>
chip_gen: v5e
topology: v5e:2x2
jax: 0.10.0
libtpu: 0.0.40
codegen_flags: <defaults>
</compile_context>

<pallas_src>
import numpy as np
import jax
import jax.numpy as jnp
from jax.experimental import pallas as pl
from jax.experimental.pallas import tpu as pltpu


# ----------------------------------------------------------------------------
# Anchor generation (plain numpy glue, identical to the PyTorch reference)
# ----------------------------------------------------------------------------
def base_anchor_generator(base_size=16, ratios=(0.5, 1.0, 2.0),
                          anchor_scales=(8, 16, 32)):
    py = base_size / 2.0
    px = base_size / 2.0
    anchor_base = np.zeros((len(ratios) * len(anchor_scales), 4), dtype=np.float32)
    for x in range(len(ratios)):
        for y in range(len(anchor_scales)):
            h = base_size * anchor_scales[y] * np.sqrt(ratios[x])
            w = base_size * anchor_scales[y] * np.sqrt(1.0 / ratios[x])
            index = x * len(anchor_scales) + y
            anchor_base[index, 0] = py - h / 2.0
            anchor_base[index, 1] = px - w / 2.0
            anchor_base[index, 2] = py + h / 2.0
            anchor_base[index, 3] = px + w / 2.0
    return anchor_base


def anchor_generator(anchor_base, feat_stride, height, width):
    shift_x = np.arange(0, width * feat_stride, feat_stride)
    shift_y = np.arange(0, height * feat_stride, feat_stride)
    shift_x, shift_y = np.meshgrid(shift_x, shift_y)
    shift = np.vstack((shift_x.ravel(), shift_y.ravel(),
                       shift_x.ravel(), shift_y.ravel())).transpose()
    A = len(anchor_base)
    K = len(shift)
    anchor = anchor_base.reshape((1, A, 4)) + \
        shift.reshape((1, K, 4)).transpose((1, 0, 2))
    anchor = anchor.reshape((K * A, 4)).astype(np.float32)
    return anchor


# ----------------------------------------------------------------------------
# Pallas kernel: conv3x3 (contiguous shifts) + ReLU + fused 1x1 heads + fg prob
# ----------------------------------------------------------------------------
def _make_rpn_kernel(H, Wp, A):
    rows = H * Wp          # outputs computed at padded width; halo cropped later
    A2, A4 = 2 * A, 4 * A

    def kernel(xflat_ref, wconv_ref, bconv_ref, whead_ref, bhead_ref, out_ref):
        # xflat_ref: (1, Lp, Cin) bf16 flattened padded feature map for one image
        Cmid = wconv_ref.shape[2]

        # 3x3 "same" conv as 9 contiguous-shift matmuls (bf16 MXU, f32 accumulate).
        # Output flat row j = h*Wp + w; tap (dy,dx) contribution sits at flat
        # input row j + dy*Wp + dx -> a contiguous window, no gather/copy.
        acc = jnp.zeros((rows, Cmid), dtype=jnp.float32)
        for dy in range(3):
            for dx in range(3):
                off = dy * Wp + dx                               # static offset
                patch = xflat_ref[0, pl.ds(off, rows), :]        # contiguous view
                acc = acc + jnp.dot(patch, wconv_ref[dy * 3 + dx],
                                    preferred_element_type=jnp.float32)

        # bias + ReLU in f32 (VPU)
        mid = jnp.maximum(acc + bconv_ref[...], 0.0)

        # Fused 1x1 heads in one lane-dense (128-wide) matmul:
        #   columns [0:4A)=loc, [4A:6A)=cls, [6A:7A)=fg-bg logit diff, rest 0.
        head = jnp.dot(mid.astype(jnp.bfloat16), whead_ref[...],
                       preferred_element_type=jnp.float32) + bhead_ref[...]

        out_ref[0] = head                                        # unmasked 128-lane store

        # fg prob: softmax([bg, fg])[1] == sigmoid(fg - bg); reciprocal on EUP.
        diff = head[:, 6 * A:7 * A]
        fg = pl.reciprocal(1.0 + jnp.exp(-diff), approx=True)
        out_ref[0, :, 6 * A:7 * A] = fg                          # tiny overwrite of diff cols

    return kernel


# ----------------------------------------------------------------------------
# Wrapper
# ----------------------------------------------------------------------------
def rpn_forward(x_nchw, params, feat_stride=16):
    """x_nchw: (N, Cin, H, W) float32.  Returns (pred_loc, pred_cls, pred_fg, anchors)."""
    wconv, bconv, wcls, bcls, wloc, bloc = params
    N, Cin, H, W = x_nchw.shape
    Cmid = wconv.shape[2]
    A2 = wcls.shape[1]
    A4 = wloc.shape[1]
    A = A2 // 2

    Wp = W + 2                     # padded width (outputs computed at this width)
    rows = H * Wp
    # pad: 1 top, 1 bottom halo row + 1 extra zero row so the (dy=2, dx=2)
    # shifted window stays in-bounds; left/right 1 column each.
    Lp = (H + 3) * Wp
    OUT = int(np.ceil((7 * A) / 128.0)) * 128   # lane-dense fused output width

    # NCHW -> NHWC (bf16), zero-pad, flatten (H, W) for contiguous shifts.
    x = jnp.transpose(x_nchw, (0, 2, 3, 1)).astype(jnp.bfloat16)
    xp = jnp.pad(x, ((0, 0), (1, 2), (1, 1), (0, 0)))
    xflat = xp.reshape(N, Lp, Cin)
    # TODO(synk): fold the pad/transpose into the kernel (manual DMA into a
    #             padded VMEM scratch) to save one HBM round-trip of the input.

    # Fused head weights / biases (built once, outside the kernel).
    wcls_f = wcls.astype(jnp.float32)
    wloc_f = wloc.astype(jnp.float32)
    bcls_f = bcls.astype(jnp.float32)
    bloc_f = bloc.astype(jnp.float32)
    whead = jnp.zeros((Cmid, OUT), dtype=jnp.float32)
    whead = whead.at[:, :A4].set(wloc_f)
    whead = whead.at[:, A4:A4 + A2].set(wcls_f)
    whead = whead.at[:, 6 * A:7 * A].set(wcls_f[:, 1::2] - wcls_f[:, 0::2])
    bhead = jnp.zeros((1, OUT), dtype=jnp.float32)
    bhead = bhead.at[:, :A4].set(bloc_f)
    bhead = bhead.at[:, A4:A4 + A2].set(bcls_f)
    bhead = bhead.at[:, 6 * A:7 * A].set(bcls_f[:, 1::2] - bcls_f[:, 0::2])

    wconv_bf = wconv.astype(jnp.bfloat16)    # MXU operands in bf16
    whead_bf = whead.astype(jnp.bfloat16)
    bconv_f = bconv.astype(jnp.float32)      # elementwise math stays f32

    out = pl.pallas_call(
        _make_rpn_kernel(H, Wp, A),
        out_shape=jax.ShapeDtypeStruct((N, rows, OUT), jnp.float32),
        grid_spec=pltpu.PrefetchScalarGridSpec(
            num_scalar_prefetch=0,
            grid=(N,),
            in_specs=[
                pl.BlockSpec((1, Lp, Cin), lambda b: (b, 0, 0)),
                pl.BlockSpec((9, Cin, Cmid), lambda b: (0, 0, 0)),
                pl.BlockSpec((1, Cmid), lambda b: (0, 0)),
                pl.BlockSpec((Cmid, OUT), lambda b: (0, 0)),
                pl.BlockSpec((1, OUT), lambda b: (0, 0)),
            ],
            out_specs=pl.BlockSpec((1, rows, OUT), lambda b: (b, 0, 0)),
        ),
        compiler_params=pltpu.CompilerParams(
            dimension_semantics=("parallel",),
            vmem_limit_bytes=64 * 1024 * 1024),
    )(xflat, wconv_bf, bconv_f, whead_bf, bhead)

    # Crop the W-halo columns and split the fused lane-dense slab.
    out = out.reshape(N, H, Wp, OUT)[:, :, :W, :]
    pred_loc = out[..., :A4].reshape(N, H * W * A, 4)
    pred_cls = out[..., A4:A4 + A2].reshape(N, H * W * A, 2)
    pred_fg = out[..., 6 * A:7 * A].reshape(N, H * W * A)

    anchor_base = base_anchor_generator(base_size=feat_stride)
    anchors = anchor_generator(anchor_base, feat_stride, H, W)
    return pred_loc, pred_cls, pred_fg, jnp.asarray(anchors)


# ----------------------------------------------------------------------------
# Pure-JAX reference (NCHW, mirrors the PyTorch forward) for sanity checking
# ----------------------------------------------------------------------------
def rpn_forward_ref(x_nchw, params):
    wconv, bconv, wcls, bcls, wloc, bloc = params
    N, Cin, H, W = x_nchw.shape
    A = wcls.shape[1] // 2
    # (9, Cin, Cmid) -> torch OIHW (Cmid, Cin, 3, 3)
    w3 = jnp.transpose(wconv.reshape(3, 3, Cin, -1), (3, 2, 0, 1))
    y = jax.lax.conv_general_dilated(x_nchw, w3, (1, 1), ((1, 1), (1, 1)),
                                     dimension_numbers=("NCHW", "OIHW", "NCHW"))
    y = jnp.maximum(y + bconv.reshape(1, -1, 1, 1), 0.0)
    wc = jnp.transpose(wcls, (1, 0))[:, :, None, None]
    wl = jnp.transpose(wloc, (1, 0))[:, :, None, None]
    cls = jax.lax.conv_general_dilated(y, wc, (1, 1), ((0, 0), (0, 0)),
                                       dimension_numbers=("NCHW", "OIHW", "NCHW"))
    cls = cls + bcls.reshape(1, -1, 1, 1)
    loc = jax.lax.conv_general_dilated(y, wl, (1, 1), ((0, 0), (0, 0)),
                                       dimension_numbers=("NCHW", "OIHW", "NCHW"))
    loc = loc + bloc.reshape(1, -1, 1, 1)
    pred_loc = jnp.transpose(loc, (0, 2, 3, 1)).reshape(N, -1, 4)
    pred_cls_nhwc = jnp.transpose(cls, (0, 2, 3, 1))
    sm = jax.nn.softmax(pred_cls_nhwc.reshape(N, H, W, A, 2), axis=4)
    pred_fg = sm[..., 1].reshape(N, -1)
    pred_cls = pred_cls_nhwc.reshape(N, -1, 2)
    return pred_loc, pred_cls, pred_fg


# ----------------------------------------------------------------------------
if __name__ == "__main__":
    # Small, deterministic config consistent with the module's forward
    N, Cin, H, W = 2, 32, 8, 8
    Cmid = 32
    A = 9            # len(ratios) * len(anchor_scales)
    feat_stride = 16

    key = jax.random.PRNGKey(0)
    k_x, k_c, k_cls, k_loc = jax.random.split(key, 4)

    x = jax.random.normal(k_x, (N, Cin, H, W), dtype=jnp.float32)

    # normal_init(std=0.01), biases = 0.  Kernel-layout weights:
    #   wconv: (9, Cin, Cmid)  index dy*3+dx  (equiv. torch (Cmid,Cin,3,3))
    #   wcls : (Cmid, 2A), wloc: (Cmid, 4A)   (equiv. torch 1x1 convs)
    wconv = 0.01 * jax.random.normal(k_c, (9, Cin, Cmid), dtype=jnp.float32)
    bconv = jnp.zeros((1, Cmid), dtype=jnp.float32)
    wcls = 0.01 * jax.random.normal(k_cls, (Cmid, A * 2), dtype=jnp.float32)
    bcls = jnp.zeros((1, A * 2), dtype=jnp.float32)
    wloc = 0.01 * jax.random.normal(k_loc, (Cmid, A * 4), dtype=jnp.float32)
    bloc = jnp.zeros((1, A * 4), dtype=jnp.float32)
    params = (wconv, bconv, wcls, bcls, wloc, bloc)

    pred_loc, pred_cls, pred_fg, anchors = rpn_forward(x, params, feat_stride)
    jax.block_until_ready((pred_loc, pred_cls, pred_fg))

    # sanity check vs pure-JAX f32 reference (kernel uses bf16 MXU operands)
    r_loc, r_cls, r_fg = rpn_forward_ref(x, params)
    assert pred_loc.shape == (N, H * W * A, 4)
    assert pred_cls.shape == (N, H * W * A, 2)
    assert pred_fg.shape == (N, H * W * A)
    assert anchors.shape == (H * W * A, 4)
    np.testing.assert_allclose(np.asarray(pred_loc), np.asarray(r_loc),
                               rtol=5e-2, atol=1e-3)
    np.testing.assert_allclose(np.asarray(pred_cls), np.asarray(r_cls),
                               rtol=5e-2, atol=1e-3)
    np.testing.assert_allclose(np.asarray(pred_fg), np.asarray(r_fg),
                               rtol=5e-2, atol=1e-3)

    print("KERNEL_OK")
</pallas_src>

<mosaic_0001>
module attributes {stable_mosaic.version = 11 : i64} {
  func.func @kernel(%arg0: i32, %arg1: memref<1x110x32xbf16, #tpu.memory_space<vmem>>, %arg2: memref<9x32x32xbf16, #tpu.memory_space<vmem>>, %arg3: memref<1x32xf32, #tpu.memory_space<vmem>>, %arg4: memref<32x128xbf16, #tpu.memory_space<vmem>>, %arg5: memref<1x128xf32, #tpu.memory_space<vmem>>, %arg6: memref<1x80x128xf32, #tpu.memory_space<vmem>>) attributes {dimension_semantics = [#tpu.dimension_semantics<parallel>], iteration_bounds = array<i64: 2>, scalar_prefetch = 0 : i64, scratch_operands = 0 : i64, tpu.core_type = #tpu.core_type<tc>, window_params = [{transform_indices = @transform_0, window_bounds = array<i64: 1, 110, 32>}, {pipeline_mode = #tpu.pipeline_mode<synchronous>, transform_indices = @transform_1, window_bounds = array<i64: 9, 32, 32>}, {pipeline_mode = #tpu.pipeline_mode<synchronous>, transform_indices = @transform_2, window_bounds = array<i64: 1, 32>}, {pipeline_mode = #tpu.pipeline_mode<synchronous>, transform_indices = @transform_3, window_bounds = array<i64: 32, 128>}, {pipeline_mode = #tpu.pipeline_mode<synchronous>, transform_indices = @transform_4, window_bounds = array<i64: 1, 128>}, {transform_indices = @transform_5, window_bounds = array<i64: 1, 80, 128>}]} {
    %cst = arith.constant 0.000000e+00 : f32
    %0 = vector.broadcast %cst : f32 to vector<80x32xf32>
    %c0 = arith.constant 0 : index
    %c0_0 = arith.constant 0 : index
    %c0_1 = arith.constant 0 : index
    %1 = vector.load %arg1[%c0, %c0_0, %c0_1] : memref<1x110x32xbf16, #tpu.memory_space<vmem>>, vector<1x80x32xbf16>
    %2 = vector.shape_cast %1 : vector<1x80x32xbf16> to vector<80x32xbf16>
    %c0_2 = arith.constant 0 : index
    %c0_3 = arith.constant 0 : index
    %c0_4 = arith.constant 0 : index
    %3 = vector.load %arg2[%c0_2, %c0_3, %c0_4] : memref<9x32x32xbf16, #tpu.memory_space<vmem>>, vector<1x32x32xbf16>
    %4 = vector.shape_cast %3 : vector<1x32x32xbf16> to vector<32x32xbf16>
    %cst_5 = arith.constant dense<0.000000e+00> : vector<80x32xf32>
    %5 = tpu.matmul %2, %4, %cst_5 {dimension_numbers = #tpu.dot_dimension_numbers<[1], [0], [0], [1], [0, 0, 1, 1], [], []>} : vector<80x32xbf16>, vector<32x32xbf16>, vector<80x32xf32> -> vector<80x32xf32>
    %6 = arith.addf %0, %5 : vector<80x32xf32>
    %c0_6 = arith.constant 0 : index
    %c1 = arith.constant 1 : index
    %c0_7 = arith.constant 0 : index
    %7 = vector.load %arg1[%c0_6, %c1, %c0_7] : memref<1x110x32xbf16, #tpu.memory_space<vmem>>, vector<1x80x32xbf16>
    %8 = vector.shape_cast %7 : vector<1x80x32xbf16> to vector<80x32xbf16>
    %c1_8 = arith.constant 1 : index
    %c0_9 = arith.constant 0 : index
    %c0_10 = arith.constant 0 : index
    %9 = vector.load %arg2[%c1_8, %c0_9, %c0_10] : memref<9x32x32xbf16, #tpu.memory_space<vmem>>, vector<1x32x32xbf16>
    %10 = vector.shape_cast %9 : vector<1x32x32xbf16> to vector<32x32xbf16>
    %cst_11 = arith.constant dense<0.000000e+00> : vector<80x32xf32>
    %11 = tpu.matmul %8, %10, %cst_11 {dimension_numbers = #tpu.dot_dimension_numbers<[1], [0], [0], [1], [0, 0, 1, 1], [], []>} : vector<80x32xbf16>, vector<32x32xbf16>, vector<80x32xf32> -> vector<80x32xf32>
    %12 = arith.addf %6, %11 : vector<80x32xf32>
    %c0_12 = arith.constant 0 : index
    %c2 = arith.constant 2 : index
    %c0_13 = arith.constant 0 : index
    %13 = vector.load %arg1[%c0_12, %c2, %c0_13] : memref<1x110x32xbf16, #tpu.memory_space<vmem>>, vector<1x80x32xbf16>
    %14 = vector.shape_cast %13 : vector<1x80x32xbf16> to vector<80x32xbf16>
    %c2_14 = arith.constant 2 : index
    %c0_15 = arith.constant 0 : index
    %c0_16 = arith.constant 0 : index
    %15 = vector.load %arg2[%c2_14, %c0_15, %c0_16] : memref<9x32x32xbf16, #tpu.memory_space<vmem>>, vector<1x32x32xbf16>
    %16 = vector.shape_cast %15 : vector<1x32x32xbf16> to vector<32x32xbf16>
    %cst_17 = arith.constant dense<0.000000e+00> : vector<80x32xf32>
    %17 = tpu.matmul %14, %16, %cst_17 {dimension_numbers = #tpu.dot_dimension_numbers<[1], [0], [0], [1], [0, 0, 1, 1], [], []>} : vector<80x32xbf16>, vector<32x32xbf16>, vector<80x32xf32> -> vector<80x32xf32>
    %18 = arith.addf %12, %17 : vector<80x32xf32>
    %c0_18 = arith.constant 0 : index
    %c10 = arith.constant 10 : index
    %c0_19 = arith.constant 0 : index
    %19 = vector.load %arg1[%c0_18, %c10, %c0_19] : memref<1x110x32xbf16, #tpu.memory_space<vmem>>, vector<1x80x32xbf16>
    %20 = vector.shape_cast %19 : vector<1x80x32xbf16> to vector<80x32xbf16>
    %c3 = arith.constant 3 : index
    %c0_20 = arith.constant 0 : index
    %c0_21 = arith.constant 0 : index
    %21 = vector.load %arg2[%c3, %c0_20, %c0_21] : memref<9x32x32xbf16, #tpu.memory_space<vmem>>, vector<1x32x32xbf16>
    %22 = vector.shape_cast %21 : vector<1x32x32xbf16> to vector<32x32xbf16>
    %cst_22 = arith.constant dense<0.000000e+00> : vector<80x32xf32>
    %23 = tpu.matmul %20, %22, %cst_22 {dimension_numbers = #tpu.dot_dimension_numbers<[1], [0], [0], [1], [0, 0, 1, 1], [], []>} : vector<80x32xbf16>, vector<32x32xbf16>, vector<80x32xf32> -> vector<80x32xf32>
    %24 = arith.addf %18, %23 : vector<80x32xf32>
    %c0_23 = arith.constant 0 : index
    %c11 = arith.constant 11 : index
    %c0_24 = arith.constant 0 : index
    %25 = vector.load %arg1[%c0_23, %c11, %c0_24] : memref<1x110x32xbf16, #tpu.memory_space<vmem>>, vector<1x80x32xbf16>
    %26 = vector.shape_cast %25 : vector<1x80x32xbf16> to vector<80x32xbf16>
    %c4 = arith.constant 4 : index
    %c0_25 = arith.constant 0 : index
    %c0_26 = arith.constant 0 : index
    %27 = vector.load %arg2[%c4, %c0_25, %c0_26] : memref<9x32x32xbf16, #tpu.memory_space<vmem>>, vector<1x32x32xbf16>
    %28 = vector.shape_cast %27 : vector<1x32x32xbf16> to vector<32x32xbf16>
    %cst_27 = arith.constant dense<0.000000e+00> : vector<80x32xf32>
    %29 = tpu.matmul %26, %28, %cst_27 {dimension_numbers = #tpu.dot_dimension_numbers<[1], [0], [0], [1], [0, 0, 1, 1], [], []>} : vector<80x32xbf16>, vector<32x32xbf16>, vector<80x32xf32> -> vector<80x32xf32>
    %30 = arith.addf %24, %29 : vector<80x32xf32>
    %c0_28 = arith.constant 0 : index
    %c12 = arith.constant 12 : index
    %c0_29 = arith.constant 0 : index
    %31 = vector.load %arg1[%c0_28, %c12, %c0_29] : memref<1x110x32xbf16, #tpu.memory_space<vmem>>, vector<1x80x32xbf16>
    %32 = vector.shape_cast %31 : vector<1x80x32xbf16> to vector<80x32xbf16>
    %c5 = arith.constant 5 : index
    %c0_30 = arith.constant 0 : index
    %c0_31 = arith.constant 0 : index
    %33 = vector.load %arg2[%c5, %c0_30, %c0_31] : memref<9x32x32xbf16, #tpu.memory_space<vmem>>, vector<1x32x32xbf16>
    %34 = vector.shape_cast %33 : vector<1x32x32xbf16> to vector<32x32xbf16>
    %cst_32 = arith.constant dense<0.000000e+00> : vector<80x32xf32>
    %35 = tpu.matmul %32, %34, %cst_32 {dimension_numbers = #tpu.dot_dimension_numbers<[1], [0], [0], [1], [0, 0, 1, 1], [], []>} : vector<80x32xbf16>, vector<32x32xbf16>, vector<80x32xf32> -> vector<80x32xf32>
    %36 = arith.addf %30, %35 : vector<80x32xf32>
    %c0_33 = arith.constant 0 : index
    %c20 = arith.constant 20 : index
    %c0_34 = arith.constant 0 : index
    %37 = vector.load %arg1[%c0_33, %c20, %c0_34] : memref<1x110x32xbf16, #tpu.memory_space<vmem>>, vector<1x80x32xbf16>
    %38 = vector.shape_cast %37 : vector<1x80x32xbf16> to vector<80x32xbf16>
    %c6 = arith.constant 6 : index
    %c0_35 = arith.constant 0 : index
    %c0_36 = arith.constant 0 : index
    %39 = vector.load %arg2[%c6, %c0_35, %c0_36] : memref<9x32x32xbf16, #tpu.memory_space<vmem>>, vector<1x32x32xbf16>
    %40 = vector.shape_cast %39 : vector<1x32x32xbf16> to vector<32x32xbf16>
    %cst_37 = arith.constant dense<0.000000e+00> : vector<80x32xf32>
    %41 = tpu.matmul %38, %40, %cst_37 {dimension_numbers = #tpu.dot_dimension_numbers<[1], [0], [0], [1], [0, 0, 1, 1], [], []>} : vector<80x32xbf16>, vector<32x32xbf16>, vector<80x32xf32> -> vector<80x32xf32>
    %42 = arith.addf %36, %41 : vector<80x32xf32>
    %c0_38 = arith.constant 0 : index
    %c21 = arith.constant 21 : index
    %c0_39 = arith.constant 0 : index
    %43 = vector.load %arg1[%c0_38, %c21, %c0_39] : memref<1x110x32xbf16, #tpu.memory_space<vmem>>, vector<1x80x32xbf16>
    %44 = vector.shape_cast %43 : vector<1x80x32xbf16> to vector<80x32xbf16>
    %c7 = arith.constant 7 : index
    %c0_40 = arith.constant 0 : index
    %c0_41 = arith.constant 0 : index
    %45 = vector.load %arg2[%c7, %c0_40, %c0_41] : memref<9x32x32xbf16, #tpu.memory_space<vmem>>, vector<1x32x32xbf16>
    %46 = vector.shape_cast %45 : vector<1x32x32xbf16> to vector<32x32xbf16>
    %cst_42 = arith.constant dense<0.000000e+00> : vector<80x32xf32>
    %47 = tpu.matmul %44, %46, %cst_42 {dimension_numbers = #tpu.dot_dimension_numbers<[1], [0], [0], [1], [0, 0, 1, 1], [], []>} : vector<80x32xbf16>, vector<32x32xbf16>, vector<80x32xf32> -> vector<80x32xf32>
    %48 = arith.addf %42, %47 : vector<80x32xf32>
    %c0_43 = arith.constant 0 : index
    %c22 = arith.constant 22 : index
    %c0_44 = arith.constant 0 : index
    %49 = vector.load %arg1[%c0_43, %c22, %c0_44] : memref<1x110x32xbf16, #tpu.memory_space<vmem>>, vector<1x80x32xbf16>
    %50 = vector.shape_cast %49 : vector<1x80x32xbf16> to vector<80x32xbf16>
    %c8 = arith.constant 8 : index
    %c0_45 = arith.constant 0 : index
    %c0_46 = arith.constant 0 : index
    %51 = vector.load %arg2[%c8, %c0_45, %c0_46] : memref<9x32x32xbf16, #tpu.memory_space<vmem>>, vector<1x32x32xbf16>
    %52 = vector.shape_cast %51 : vector<1x32x32xbf16> to vector<32x32xbf16>
    %cst_47 = arith.constant dense<0.000000e+00> : vector<80x32xf32>
    %53 = tpu.matmul %50, %52, %cst_47 {dimension_numbers = #tpu.dot_dimension_numbers<[1], [0], [0], [1], [0, 0, 1, 1], [], []>} : vector<80x32xbf16>, vector<32x32xbf16>, vector<80x32xf32> -> vector<80x32xf32>
    %54 = arith.addf %48, %53 : vector<80x32xf32>
    %c0_48 = arith.constant 0 : index
    %c0_49 = arith.constant 0 : index
    %55 = vector.load %arg3[%c0_48, %c0_49] : memref<1x32xf32, #tpu.memory_space<vmem>>, vector<1x32xf32>
    %56 = vector.broadcast %55 : vector<1x32xf32> to vector<80x32xf32>
    %57 = arith.addf %54, %56 : vector<80x32xf32>
    %cst_50 = arith.constant 0.000000e+00 : f32
    %58 = vector.broadcast %cst_50 : f32 to vector<80x32xf32>
    %59 = arith.maximumf %57, %58 : vector<80x32xf32>
    %60 = arith.truncf %59 : vector<80x32xf32> to vector<80x32xbf16>
    %c0_51 = arith.constant 0 : index
    %c0_52 = arith.constant 0 : index
    %61 = vector.load %arg4[%c0_51, %c0_52] : memref<32x128xbf16, #tpu.memory_space<vmem>>, vector<32x128xbf16>
    %cst_53 = arith.constant dense<0.000000e+00> : vector<80x128xf32>
    %62 = tpu.matmul %60, %61, %cst_53 {dimension_numbers = #tpu.dot_dimension_numbers<[1], [0], [0], [1], [0, 0, 1, 1], [], []>} : vector<80x32xbf16>, vector<32x128xbf16>, vector<80x128xf32> -> vector<80x128xf32>
    %c0_54 = arith.constant 0 : index
    %c0_55 = arith.constant 0 : index
    %63 = vector.load %arg5[%c0_54, %c0_55] : memref<1x128xf32, #tpu.memory_space<vmem>>, vector<1x128xf32>
    %64 = vector.broadcast %63 : vector<1x128xf32> to vector<80x128xf32>
    %65 = arith.addf %62, %64 : vector<80x128xf32>
    %c0_56 = arith.constant 0 : index
    %c0_57 = arith.constant 0 : index
    %c0_58 = arith.constant 0 : index
    %66 = vector.load %arg6[%c0_56, %c0_57, %c0_58] : memref<1x80x128xf32, #tpu.memory_space<vmem>>, vector<1x80x128xf32>
    %67 = vector.shape_cast %66 : vector<1x80x128xf32> to vector<80x128xf32>
    %68 = vector.shape_cast %65 : vector<80x128xf32> to vector<1x80x128xf32>
    tpu.vector_store %arg6[%c0_56, %c0_57, %c0_58], %68 {strides = array<i32>} : memref<1x80x128xf32, #tpu.memory_space<vmem>>, vector<1x80x128xf32>,
    %69 = vector.extract_strided_slice %65 {offsets = [0, 54], sizes = [80, 9], strides = [1, 1]} : vector<80x128xf32> to vector<80x9xf32>
    %cst_59 = arith.constant 0.000000e+00 : f32
    %70 = vector.broadcast %cst_59 : f32 to vector<80x9xf32>
    %71 = arith.subf %70, %69 : vector<80x9xf32>
    %72 = math.exp %71 : vector<80x9xf32>
    %cst_60 = arith.constant 1.000000e+00 : f32
    %73 = vector.broadcast %cst_60 : f32 to vector<80x9xf32>
    %74 = arith.addf %73, %72 : vector<80x9xf32>
    %75 = tpu.reciprocal %74 {approx = true} : vector<80x9xf32> -> vector<80x9xf32>
    %c0_61 = arith.constant 0 : index
    %c0_62 = arith.constant 0 : index
    %c54 = arith.constant 54 : index
    %76 = vector.load %arg6[%c0_61, %c0_62, %c54] : memref<1x80x128xf32, #tpu.memory_space<vmem>>, vector<1x80x9xf32>
    %77 = vector.shape_cast %76 : vector<1x80x9xf32> to vector<80x9xf32>
    %78 = vector.shape_cast %75 : vector<80x9xf32> to vector<1x80x9xf32>
    tpu.vector_store %arg6[%c0_61, %c0_62, %c54], %78 {strides = array<i32>} : memref<1x80x128xf32, #tpu.memory_space<vmem>>, vector<1x80x9xf32>,
    return
  }
  func.func @transform_0(%arg0: i32) -> (i32, i32, i32) {
    %c0_i32 = arith.constant 0 : i32
    %c0_i32_0 = arith.constant 0 : i32
    %c0_i32_1 = arith.constant 0 : i32
    return %arg0, %c0_i32, %c0_i32_0 : i32, i32, i32
  }
  func.func @transform_1(%arg0: i32) -> (i32, i32, i32) {
    %c0_i32 = arith.constant 0 : i32
    %c0_i32_0 = arith.constant 0 : i32
    %c0_i32_1 = arith.constant 0 : i32
    %c0_i32_2 = arith.constant 0 : i32
    return %c0_i32, %c0_i32_0, %c0_i32_1 : i32, i32, i32
  }
  func.func @transform_2(%arg0: i32) -> (i32, i32) {
    %c0_i32 = arith.constant 0 : i32
    %c0_i32_0 = arith.constant 0 : i32
    %c0_i32_1 = arith.constant 0 : i32
    return %c0_i32, %c0_i32_0 : i32, i32
  }
  func.func @transform_3(%arg0: i32) -> (i32, i32) {
    %c0_i32 = arith.constant 0 : i32
    %c0_i32_0 = arith.constant 0 : i32
    %c0_i32_1 = arith.constant 0 : i32
    return %c0_i32, %c0_i32_0 : i32, i32
  }
  func.func @transform_4(%arg0: i32) -> (i32, i32) {
    %c0_i32 = arith.constant 0 : i32
    %c0_i32_0 = arith.constant 0 : i32
    %c0_i32_1 = arith.constant 0 : i32
    return %c0_i32, %c0_i32_0 : i32, i32
  }
  func.func @transform_5(%arg0: i32) -> (i32, i32, i32) {
    %c0_i32 = arith.constant 0 : i32
    %c0_i32_0 = arith.constant 0 : i32
    %c0_i32_1 = arith.constant 0 : i32
    return %arg0, %c0_i32, %c0_i32_0 : i32, i32, i32
  }
}

</mosaic_0001>

<bundles_post_ra>
// kernel: tpu_custom_call.1
= control target key start
LH: loop header
LB: loop body
LE: loop exit
PB: predicated region body
PF: predicated region fallthrough
CT: control target
= control target key end

     0   :  { %10 = vsyncpa [#allocation3], 0  ;;  %s2452_s0 = inlined_call_operand.vmem [shape: bf16[2,110,32], index: 0, kind: input, shape index: {}]   ;;  %s2453_s1 = inlined_call_operand.vmem [shape: bf16[9,32,32], index: 1, kind: input, shape index: {}]   ;;  %s2454_s2 = inlined_call_operand.vmem [shape: f32[1,32], index: 2, kind: input, shape index: {}]   ;;  %s2455_s3 = inlined_call_operand.hbm [shape: bf16[32,128], index: 3, kind: input, shape index: {}]   ;;  %s2456_s4 = inlined_call_operand.vmem [shape: f32[1,128], index: 4, kind: input, shape index: {}]   ;;  %s2457_s5 = inlined_call_operand.hbm [shape: f32[2,80,128], index: 5, kind: output, shape index: {}]  }
   0x1   :  { %11 = vsyncpa [#allocation4], 0 }
   0x2   :  { %13 = vsyncpa [#allocation4 + $0x1], 0  ;;  %s2002_s18 = smov 0   ;;  %s2004_s19 = smov 0  }
   0x3   :  { %s2006_s20 = smov 0   ;;  %s2008_s21 = smov 0  }
   0x4 LB: > { %s2023_s22 = sadd.s32 4294967295, %s1965_s21   ;;  %s1507_s23 = sadd.s32 4294967294, %s1965_s21   ;;  %s1965_s21 = sphi %s2008_s21, %s2463_s21   ;;  %s1961_s20 = sphi %s2006_s20, %s2462_s20   ;;  %s1957_s19 = sphi %s2004_s19, %s2461_s19   ;;  %s1953_s18 = sphi %s2002_s18, %s2460_s18  }
   0x5   : > { %s2027_s24 = sadd.s32 1, %s1965_s21   ;;  %s136_s25 = sadd.s32 1, %s1961_s20 }
   0x6   : > { %s133_s26 = ssub.s32 %s1965_s21, %s2027_s24  ;;  %p146_p0 = scmp.ne.s32.totalorder %s1961_s20, %s1957_s19 }
   0x7   : > { %p134_p1 = scmp.eq.s32.totalorder %s133_s26, 0  ;;  %p147_p2 = scmp.eq.s32.totalorder %s2023_s22, 1 }
   0x8   : > { %p152_p3 = scmp.ne.s32.totalorder %s1957_s19, %s1953_s18  ;;  %p153_p4 = scmp.eq.s32.totalorder %s1507_s23, 1 }
   0x9   : > { %s2038_s27 = scalar_select %p134_p1, %s1961_s20, %s136_s25  }
   0xa   : > { %p2040_p5 = por %p147_p2, %p146_p0  ;;  %p2044_p6 = por %p153_p4, %p152_p3 }
   0xb   : > { %p1508_p7 = scmp.ge.s32.totalorder %s1965_s21, 1  ;;  %p160_p8 = scmp.lt.s32.totalorder %s1965_s21, 3 }
   0xc   : > { %p1787_p9 = scmp.eq.s32.totalorder %s2023_s22, 0  ;;  %s177_s7 = sshll.u32 %s2455_s3, 4  ;;  %s178_s7 = int_to_ptr.hbm [resolvable:$true] %s177_s7 }
   0xd   : > { %p161_p10 = pnand %p1508_p7, %p160_p8  ;;  %s1967_s8 = smov [#allocation2]  }
   0xe   : > { %s179_s9 = sshll.u32 %s1967_s8, 4  ;;  %s1968_s10 = smov 64   ;;  %s180_s9 = int_to_ptr.vmem [resolvable:$true] %s179_s9 }
   0xf   : > { %p1779_p11 = pneg %p161_p10  ;;  %s1969_s11 = smov 4  }
  0x10   : > { %206 = sbr.rel (%p161_p10) target bundleno = 531 (0x213), region = 40 }
  0x11   : > { %p1780_p12 = pnand %p1787_p9, %p1779_p11 }
  0x13   : > { %1782 = dma.hbm_to_vmem [thread:$0]  (!%p1780_p12), %s178_s7, 256, %s180_s9, [#allocation3], %s1968_s10, %s1968_s10, %s1969_s11  }
  0x15   : > { %1944 = dma.done.wait (%p1787_p9), [#allocation3], 256  }
  0x16   : > { %1946 = vsyncadd (%p1787_p9), [#allocation3], 4294967040  ;;  %p235_p13 = scmp.lt.s32.totalorder %s2023_s22, 1  ;;  %v1734_v0 = vld [vmem:[%s2453_s1 + $0x18] sm:$0xff]  ;;  %v1732_v1 = vld [vmem:[%s2453_s1 + $0x8] sm:$0xff]  ;;  %vm346_vm1 = vcmask 261120  }
  0x17   : > { %368 = vmatpush.bf16.msra.mxu0 %v1734_v0  ;;  %1766 = vmatpush.bf16.msra.mxu2 %v1734_v0  ;;  %v1733_v4 = vld [vmem:[%s2453_s1 + $0x10] sm:$0xff]  ;;  %v1731_v9 = vld [vmem:[%s2453_s1] sm:$0xff]  ;;  %v1744_v15 = vld [vmem:[%s2453_s1 + $0x48] sm:$0xff]  ;;  %vm289_vm0 = vsmask.f32 7424  ;;  %vm461_vm2 = vcmask 1046528  }
  0x18   : > { %s236_s12 = scalar_select %p235_p13, %s2023_s22, 1  ;;  %424 = vmatpush.bf16.msra.mxu1 %v1732_v1  ;;  %1768 = vmatpush.bf16.msra.mxu3 %v1732_v1  ;;  %v1736_v16 = vld [vmem:[%s2453_s1 + $0x28] sm:$0xff]  ;;  %v1742_v18 = vld [vmem:[%s2453_s1 + $0x38] sm:$0xff]  ;;  %v1735_v23 = vld [vmem:[%s2453_s1 + $0x20] sm:$0xff]  ;;  %vm679_vm3 = vsmask.f32 6400 }
  0x19   : > { %v1743_v27 = vld [vmem:[%s2453_s1 + $0x40] sm:$0xff]  ;;  %v1741_v28 = vld [vmem:[%s2453_s1 + $0x30] sm:$0xff]  ;;  %v1752_v31 = vld [vmem:[%s2453_s1 + $0x68] sm:$0xff]  ;;  %vm813_vm4 = vcmask 1045504   ;;  %vm1031_vm5 = vsmask.f32 5376 }
  0x1a   : > { %s1771_s13 = smul.u32 56, %s236_s12  ;;  %v1754_v32 = vld [vmem:[%s2453_s1 + $0x78] sm:$0xff]  ;;  %v1745_v37 = vld [vmem:[%s2453_s1 + $0x50] sm:$0xff]  ;;  %v1756_v50 = vld [vmem:[%s2453_s1 + $0x88] sm:$0xff]  ;;  %vm1165_vm6 = vcmask 1044480   ;;  %s232_s8 = sand.u32 1, %s1957_s19  }
  0x1b   : > { %369 = vmatpush.bf16.msra.mxu0 %v1733_v4  ;;  %1767 = vmatpush.bf16.msra.mxu2 %v1733_v4  ;;  %v1746_v33 = vld [vmem:[%s2453_s1 + $0x58] sm:$0xff]  ;;  %s1770_s9 = smul.u32 80, %s232_s8  ;;  %vm1406_vm7 = vcmask 515504   ;;  %s1919_s7 = scalar_lea.hbm %s2457_s5, 160 }
  0x1c   : > { %s2065_s16 = scalar_lea.vmem %s2452_s0, %s1771_s13  ;;  %425 = vmatpush.bf16.msra.mxu1 %v1731_v9  ;;  %1769 = vmatpush.bf16.msra.mxu3 %v1731_v9  ;;  %s1772_s13 = smul.u32 80, %s2023_s22 }
  0x1d   : > { %v1760_v2 = vld [vmem:[%s2065_s16] sm:$0xff]   ;;  %v2075_v3 = vld [vmem:[%s2065_s16 + $0x8] sm:$0xff]  ;;  %v2081_v7 = vld [vmem:[%s2065_s16 + $0x18] sm:$0xff]  ;;  %s2377_s12 = scalar_lea.vmem [#allocation5], %s1770_s9  ;;  %s1418_s22 = scalar_lea.sflag [#allocation4], %s232_s8 }
  0x1e   : > { %v291_v5 = vshrl.u32 %v1760_v2, 16  ;;  %v293_v6 = vshll.u32 %v1760_v2, 16  ;;  %v2084_v8 = vld [vmem:[%s2065_s16 + $0x20] sm:$0xff]  ;;  %v298_v10 = vshll.u32 %v2075_v3, 16  ;;  %v314_v12 = vshll.u32 %v2081_v7, 16  ;;  %v2122_v30 = vld [vmem:[%s2065_s16 + $0x10] sm:$0xff]  ;;  %s1429_s17 = scalar_lea.hbm %s2457_s5, %s1772_s13 }
  0x1f   : > { %v318_v13 = vshrl.u32 %v2081_v7, 16  ;;  %v322_v14 = vshll.u32 %v2084_v8, 16  ;;  %v255_v19 = vld [vmem:[%s2065_s16 + $0x28] sm:$0x1]  ;;  %766 = vmatpush.bf16.msrb.mxu0 %v1744_v15  ;;  %506 = vmatpush.bf16.msrb.mxu2 %v1736_v16  ;;  %v302_v35 = vshrl.u32 %v2075_v3, 16  ;;  %v306_v36 = vshll.u32 %v2122_v30, 16 }
  0x20   : > { %v295_v11 = vrot.slane %v293_v6, 1  ;;  %v300_v17 = vrot.slane %v298_v10, 1  ;;  %v2103_v21 = vrot.slane %v314_v12, 1  ;;  %v282_v26 = vunpack.c.l.b16 %v255_v19  ;;  %632 = vmatpush.bf16.msrb.mxu3 %v1742_v18  ;;  %1555 = vmatmul.msk.bf16.vlgmr.msra.gmra.mxu1 %vm346_vm1, %v1760_v2  ;;  %v544_v46 = vld [vmem:[%s2065_s16 + $0x4] sm:$0xe]  ;;  %v2147_v47 = vld [vmem:[%s2065_s16 + $0x8] sm:$0xff]  }
  0x21   : > { %v324_v22 = vrot.slane %v322_v14, 1  ;;  %1558 = vmatmul.msk.bf16.vlgmr.msra.gmra.mxu3 %vm346_vm1, %v2081_v7  ;;  %858 = vmatpush.bf16.msrb.mxu1 %v1746_v33  ;;  %v326_v38 = vshrl.u32 %v2084_v8, 16  ;;  %v308_v41 = vrot.slane %v306_v36, 1  ;;  %v571_v48 = vunpack.c.l.b16 %v544_v46  ;;  %v1763_v51 = vld [vmem:[%s2065_s16] sm:$0xf0]  ;;  %v2163_v54 = vld [vmem:[%s2065_s16 + $0xc] sm:$0xff] }
  0x22   : > { %v296_v20 = vor.u32 %v295_v11, %v291_v5  ;;  %v320_v25 = vor.u32 %v318_v13, %v2103_v21  ;;  %v2134_v34 = vpack.c.b16 %v282_v26, %v282_v26  ;;  %v304_v40 = vor.u32 %v302_v35, %v300_v17  ;;  %v1764_v52 = vld [vmem:[%s2065_s16] sm:$0xe]  ;;  %v804_v1 = vld [vmem:[%s2065_s16 + $0x4] sm:$0xc]  ;;  %s1430_s23 = sshll.u32 %s2377_s12, 4  ;;  %s1432_s25 = sshll.u32 %s1429_s17, 4  ;;  %s1431_s23 = int_to_ptr.vmem [resolvable:$true] %s1430_s23  ;;  %s1433_s25 = int_to_ptr.hbm [resolvable:$true] %s1432_s25 }
  0x23   : > { %507 = vmatpush.bf16.msrb.mxu2 %v1735_v23  ;;  %767 = vmatpush.bf16.msrb.mxu0 %v1743_v27  ;;  %v328_v42 = vor.u32 %v326_v38, %v324_v22  ;;  %v572_v49 = vunpack.c.l.b16 %v2147_v47  ;;  %v310_v53 = vshrl.u32 %v2122_v30, 16  ;;  %v1765_v56 = vor.u32 %v1764_v52, %v1763_v51  ;;  %v1751_v10 = vld [vmem:[%s2453_s1 + $0x60] sm:$0xff]  ;;  %s1913_s26 = sshra.s32 %s1433_s25, 4  ;;  %s1914_s26 = int_to_ptr.hbm [resolvable:$true] %s1913_s26 }
  0x24   : > { %v301_v24 = vsel %vm289_vm0, %v296_v20, %v300_v17  ;;  %v325_v29 = vsel %vm289_vm0, %v320_v25, %v324_v22  ;;  %633 = vmatpush.bf16.msrb.mxu3 %v1741_v28  ;;  %v330_v39 = vshll.u32 %v2134_v34, 16  ;;  %v309_v44 = vsel %vm289_vm0, %v304_v40, %v308_v41  ;;  %v1738_v17 = vld [vmem:[%s2065_s16 + $0x14] sm:$0xff]  ;;  %v1739_v36 = vld [vmem:[%s2065_s16 + $0x1c] sm:$0xff]  ;;  %s1915_s30 = scalar_lea.hbm %s1914_s26, 80  ;;  %p1920_p3 = scmp.lt.s32.totalorder %s1914_s26, %s2457_s5 }
  0x25   : > { %1542 = vmatmul.msk.bf16.vlgmr.msra.gmra.mxu0 %vm346_vm1, %v301_v24  ;;  %1545 = vmatmul.msk.bf16.vlgmr.msra.gmra.mxu2 %vm346_vm1, %v325_v29  ;;  %v582_v55 = vpack.c.b16 %v572_v49, %v571_v48  ;;  %v312_v57 = vor.u32 %v310_v53, %v308_v41  ;;  %v589_v59 = vrot.slane %v2163_v54, 1  ;;  %v462_v60 = vrot.slane %v1765_v56, 1  ;;  %v1753_v29 = vld [vmem:[%s2453_s1 + $0x70] sm:$0xff]  ;;  %v1740_v48 = vld [vmem:[%s2065_s16 + $0x24] sm:$0xff]  ;;  %p1916_p0 = scmp.ne.s32.totalorder %s1914_s26, %s1915_s30  ;;  %p1921_p4 = scmp.lt.s32.totalorder %s1919_s7, %s1915_s30 }
  0x26   : > { %859 = vmatpush.bf16.msrb.mxu1 %v1745_v37  ;;  %v332_v43 = vrot.slane %v330_v39, 1  ;;  %v463_v61 = vrot.slane %v2075_v3, 1  ;;  %v692_v5 = vshll.u32 %v2163_v54, 16  ;;  %v811_v6 = vunpack.c.l.b16 %v804_v1 }
  0x27   : > { %984 = vmatpush.bf16.msra.mxu2 %v1752_v31  ;;  %1210 = vmatpush.bf16.msra.mxu0 %v1756_v50  ;;  %v588_v58 = vrot.slane %v582_v55, 1  ;;  %v317_v62 = vsel %vm289_vm0, %v312_v57, %v2103_v21  ;;  %v681_v2 = vshrl.u32 %v582_v55, 16  ;;  %v684_v4 = vshll.u32 %v582_v55, 16  ;;  %v554_v55 = vld [vmem:[%s2065_s16 + $0x2c] sm:$0x1]  ;;  %p1917_p1 = pnand %p1916_p0, %p2040_p5  ;;  %p1922_p7 = por %p1921_p4, %p1920_p3 }
  0x28   : > { %1118 = vmatpush.bf16.msra.mxu3 %v1754_v32  ;;  %v333_v45 = vsel %vm289_vm0, %v328_v42, %v332_v43  ;;  %v464_v0 = vsel %vm461_vm2, %v462_v60, %v463_v61  ;;  %v467_v9 = vrot.slane %v2081_v7, 1  ;;  %v469_v11 = vrot.slane %v2084_v8, 1 }
  0x29   : > { %v590_v63 = vsel %vm461_vm2, %v588_v58, %v589_v59  ;;  %v683_v13 = vrot.slane %v681_v2, 1  ;;  %v686_v14 = vrot.slane %v684_v4, 2  ;;  %v694_v16 = vrot.slane %v692_v5, 2  ;;  %p1918_p2 = pneg %p1917_p1 }
  0x2a   : > { %v470_v12 = vsel %vm461_vm2, %v467_v9, %v469_v11  ;;  %v812_v18 = vpack.c.b16 %v572_v49, %v811_v6  ;;  %v591_v21 = vrot.slane %v1738_v17, 1  ;;  %v815_v22 = vrot.slane %v2163_v54, 2 }
  0x2b   : > { %985 = vmatpush.bf16.msra.mxu2 %v1751_v10  ;;  %v687_v19 = vor.u32 %v686_v14, %v683_v13  ;;  %v465_v23 = vrot.slane %v2122_v30, 1  ;;  %v698_v27 = vshrl.u32 %v1738_v17, 16  ;;  %v701_v28 = vshll.u32 %v1738_v17, 16  ;;  %p1923_p8 = pnand %p1922_p7, %p1918_p2 }
  0x2c   : > { %v814_v7 = vrot.slane %v812_v18, 2  ;;  %v592_v24 = vsel %vm461_vm2, %v589_v59, %v591_v21  ;;  %v471_v31 = vrot.slane %v2134_v34, 1  ;;  %1119 = vmatpush.bf16.msra.mxu3 %v1753_v29  ;;  %v593_v38 = vrot.slane %v1739_v36, 1 }
  0x2d   : > { %v466_v26 = vsel %vm461_vm2, %v463_v61, %v465_v23  ;;  %v700_v33 = vrot.slane %v698_v27, 1  ;;  %v703_v35 = vrot.slane %v701_v28, 2  ;;  %v817_v39 = vrot.slane %v1738_v17, 2 }
  0x2e   : > { %v816_v25 = vsel %vm813_vm4, %v814_v7, %v815_v22  ;;  %v472_v32 = vsel %vm461_vm2, %v469_v11, %v471_v31  ;;  %v594_v41 = vsel %vm461_vm2, %v591_v21, %v593_v38  ;;  %v468_v43 = vsel %vm461_vm2, %v465_v23, %v467_v9 }
  0x2f   : > { %v704_v37 = vor.u32 %v703_v35, %v700_v33  ;;  %v818_v42 = vsel %vm813_vm4, %v815_v22, %v817_v39  ;;  %v707_v34 = vshrl.u32 %v1739_v36, 16  ;;  %v595_v50 = vrot.slane %v1740_v48, 1  ;;  %v1156_v33 = vld [vmem:[%s2065_s16 + $0x8] sm:$0x8] }
  0x30   : > { %1556 = vmatmul.msk.bf16.gmra.mxu1 %vm346_vm1, %v2075_v3  ;;  %v689_v3 = vshrl.u32 %v2163_v54, 16  ;;  %v819_v51 = vrot.slane %v1739_v36, 2  ;;  %v716_v56 = vshrl.u32 %v1740_v48, 16  ;;  %v719_v57 = vshll.u32 %v1740_v48, 16 }
  0x31   : > { %1559 = vmatmul.msk.bf16.gmra.mxu3 %vm346_vm1, %v2084_v8  ;;  %v596_v53 = vsel %vm461_vm2, %v593_v38, %v595_v50  ;;  %v581_v58 = vunpack.c.l.b16 %v554_v55  ;;  %v821_v4 = vrot.slane %v1740_v48, 2  ;;  %v924_v5 = vunpack.c.h.b16 %v2147_v47 }
  0x32   : > { %v691_v15 = vrot.slane %v689_v3, 1  ;;  %v820_v54 = vsel %vm813_vm4, %v817_v39, %v819_v51  ;;  %v718_v59 = vrot.slane %v716_v56, 1  ;;  %v721_v60 = vrot.slane %v719_v57, 2 }
  0x33   : > { %v587_v61 = vpack.c.b16 %v581_v58, %v581_v58  ;;  %v822_v11 = vsel %vm813_vm4, %v819_v51, %v821_v4 }
  0x34   : > { %v695_v20 = vor.u32 %v694_v16, %v691_v15 }
  0x35   : > { %1543 = vmatmul.msk.bf16.gmra.mxu0 %vm346_vm1, %v309_v44  ;;  %1546 = vmatmul.msk.bf16.gmra.mxu2 %vm346_vm1, %v333_v45  ;;  %v710_v44 = vshll.u32 %v1739_v36, 16  ;;  %v709_v45 = vrot.slane %v707_v34, 1  ;;  %v597_v2 = vrot.slane %v587_v61, 1  ;;  %v1163_v36 = vunpack.c.l.b16 %v1156_v33 }
  0x36   : > { %v696_v8 = vsel %vm679_vm3, %v687_v19, %v695_v20  ;;  %v705_v40 = vsel %vm679_vm3, %v695_v20, %v704_v37 }
  0x37   : > { %v712_v46 = vrot.slane %v710_v44, 2  ;;  %v598_v10 = vsel %vm461_vm2, %v595_v50, %v597_v2  ;;  %v1164_v39 = vpack.c.b16 %v924_v5, %v1163_v36 }
  0x39   : > { %v713_v49 = vor.u32 %v712_v46, %v709_v45 }
  0x3b   : > { %v714_v52 = vsel %vm679_vm3, %v704_v37, %v713_v49 }
  0x40   : > { %1557 = vmatmul.msk.bf16.gmra.mxu1 %vm346_vm1, %v2122_v30  ;;  %v1755_v30 = vld [vmem:[%s2453_s1 + $0x80] sm:$0xff] }
  0x41   : > { %1605 = vmatmul.msk.bf16.vlgmr.msrb.gmra.mxu3 %vm346_vm1, %v590_v63  ;;  %1211 = vmatpush.bf16.msra.mxu0 %v1755_v30  ;;  %v896_v63 = vld [vmem:[%s2065_s16 + $0x8] sm:$0xc] }
  0x42   : > { %v923_v3 = vunpack.c.l.b16 %v896_v63 }
  0x44   : > { %v934_v13 = vpack.c.b16 %v924_v5, %v923_v3  ;;  %v2278_v3 = vld [vmem:[%s2065_s16 + $0x28] sm:$0xff] }
  0x45   : > { %1544 = vmatmul.msk.bf16.gmra.mxu0 %vm346_vm1, %v317_v62  ;;  %1572 = vmatmul.msk.bf16.vlgmr.msrb.gmra.mxu2 %vm346_vm1, %v464_v0  ;;  %v670_v62 = vld [vmem:[%s2065_s16 + $0x2c] sm:$0x3]  ;;  %v722_v0 = vor.u32 %v721_v60, %v718_v59 }
  0x46   : > { %v677_v1 = vunpack.c.l.b16 %v670_v62  ;;  %v1033_v47 = vshrl.u32 %v934_v13, 16  ;;  %v1036_v16 = vshll.u32 %v934_v13, 16  ;;  %v940_v27 = vrot.slane %v934_v13, 2 }
  0x47   : > { %v723_v6 = vsel %vm679_vm3, %v713_v49, %v722_v0  ;;  %v2257_v49 = vld [vmem:[%s2065_s16 + $0x20] sm:$0xff] }
  0x48   : > { %v678_v9 = vpack.c.b16 %v677_v1, %v677_v1  ;;  %v1035_v21 = vrot.slane %v1033_v47, 2  ;;  %v1038_v7 = vrot.slane %v1036_v16, 3  ;;  %v1059_v51 = vshrl.u32 %v2257_v49, 16  ;;  %v1022_v16 = vld [vmem:[%s2065_s16 + $0x30] sm:$0x7] }
  0x49   : > { %v945_v61 = vrot.slane %v2257_v49, 2 }
  0x4a   : > { %v725_v14 = vshrl.u32 %v678_v9, 16  ;;  %v728_v15 = vshll.u32 %v678_v9, 16  ;;  %v1061_v57 = vrot.slane %v1059_v51, 2 }
  0x4c   : > { %v727_v19 = vrot.slane %v725_v14, 1  ;;  %v730_v20 = vrot.slane %v728_v15, 2 }
  0x50   : > { %1639 = vmatmul.msk.bf16.vlgmr.msrb.gmra.mxu1 %vm346_vm1, %v816_v25 }
  0x51   : > { %1606 = vmatmul.msk.bf16.gmra.mxu3 %vm346_vm1, %v592_v24  ;;  %v1039_v24 = vor.u32 %v1038_v7, %v1035_v21 }
  0x55   : > { %1622 = vmatmul.msk.bf16.vlgmr.msrb.gmra.mxu0 %vm346_vm1, %v696_v8  ;;  %1573 = vmatmul.msk.bf16.gmra.mxu2 %vm346_vm1, %v466_v26  ;;  %v731_v8 = vor.u32 %v730_v20, %v727_v19  ;;  %v823_v26 = vrot.slane %v678_v9, 2  ;;  %v1071_v9 = vshll.u32 %v2278_v3, 16  ;;  %v1029_v19 = vunpack.c.l.b16 %v1022_v16 }
  0x56   : > { %v947_v20 = vrot.slane %v2278_v3, 2 }
  0x57   : > { %v732_v29 = vsel %vm679_vm3, %v722_v0, %v731_v8  ;;  %v824_v31 = vsel %vm813_vm4, %v821_v4, %v823_v26  ;;  %v1073_v47 = vrot.slane %v1071_v9, 3 }
  0x58   : > { %v948_v26 = vsel %vm813_vm4, %v945_v61, %v947_v20 }
  0x60   : > { %1640 = vmatmul.msk.bf16.gmra.mxu1 %vm346_vm1, %v818_v42  ;;  %v1166_v42 = vrot.slane %v1164_v39, 3 }
  0x61   : > { %1607 = vmatmul.msk.bf16.gmra.mxu3 %vm346_vm1, %v594_v41 }
  0x65   : > { %1623 = vmatmul.msk.bf16.gmra.mxu0 %vm346_vm1, %v705_v40  ;;  %1574 = vmatmul.msk.bf16.gmra.mxu2 %vm346_vm1, %v468_v43 }
  0x70   : > { %1641 = vmatmul.msk.bf16.gmra.mxu1 %vm346_vm1, %v820_v54 }
  0x71   : > { %1608 = vmatmul.msk.bf16.gmra.mxu3 %vm346_vm1, %v596_v53 }
  0x75   : > { %1624 = vmatmul.msk.bf16.gmra.mxu0 %vm346_vm1, %v714_v52  ;;  %1575 = vmatmul.msk.bf16.gmra.mxu2 %vm346_vm1, %v470_v12  ;;  %v2229_v12 = vld [vmem:[%s2065_s16 + $0x10] sm:$0xff]  ;;  %v1062_v52 = vshll.u32 %v2257_v49, 16 }
  0x76   : > { %v1041_v17 = vshrl.u32 %v2229_v12, 16  ;;  %v1044_v18 = vshll.u32 %v2229_v12, 16  ;;  %v941_v28 = vrot.slane %v2229_v12, 2  ;;  %v1167_v43 = vrot.slane %v2229_v12, 3 }
  0x77   : > { %v1064_v58 = vrot.slane %v1062_v52, 3 }
  0x78   : > { %v1043_v22 = vrot.slane %v1041_v17, 2  ;;  %v1046_v23 = vrot.slane %v1044_v18, 3  ;;  %v942_v35 = vsel %vm813_vm4, %v940_v27, %v941_v28  ;;  %v1168_v46 = vsel %vm1165_vm6, %v1166_v42, %v1167_v43 }
  0x79   : > { %v1065_v60 = vor.u32 %v1064_v58, %v1061_v57  ;;  %v1171_v17 = vrot.slane %v2257_v49, 3 }
  0x7a   : > { %v1047_v25 = vor.u32 %v1046_v23, %v1043_v22 }
  0x7c   : > { %v1048_v30 = vsel %vm1031_vm5, %v1039_v24, %v1047_v25 }
  0x80   : > { %1642 = vmatmul.msk.bf16.gmra.mxu1 %vm346_vm1, %v822_v11 }
  0x81   : > { %1609 = vmatmul.msk.bf16.gmra.mxu3 %vm346_vm1, %v598_v10 }
  0x85   : > { %1625 = vmatmul.msk.bf16.gmra.mxu0 %vm346_vm1, %v723_v6  ;;  %1576 = vmatmul.msk.bf16.gmra.mxu2 %vm346_vm1, %v472_v32  ;;  %v2242_v32 = vld [vmem:[%s2065_s16 + $0x18] sm:$0xff]  ;;  %v1068_v6 = vshrl.u32 %v2278_v3, 16 }
  0x86   : > { %v1050_v37 = vshrl.u32 %v2242_v32, 16  ;;  %v1053_v38 = vshll.u32 %v2242_v32, 16  ;;  %v943_v44 = vrot.slane %v2242_v32, 2  ;;  %v1169_v59 = vrot.slane %v2242_v32, 3 }
  0x87   : > { %v1070_v15 = vrot.slane %v1068_v6, 2 }
  0x88   : > { %v1052_v40 = vrot.slane %v1050_v37, 2  ;;  %v1055_v41 = vrot.slane %v1053_v38, 3  ;;  %v944_v50 = vsel %vm813_vm4, %v941_v28, %v943_v44  ;;  %v1170_v1 = vsel %vm1165_vm6, %v1167_v43, %v1169_v59  ;;  %v906_v28 = vld [vmem:[%s2065_s16 + $0x30] sm:$0x3] }
  0x89   : > { %v946_v5 = vsel %vm813_vm4, %v943_v44, %v945_v61  ;;  %v1074_v18 = vor.u32 %v1073_v47, %v1070_v15  ;;  %v1172_v23 = vsel %vm1165_vm6, %v1169_v59, %v1171_v17  ;;  %v933_v32 = vunpack.c.l.b16 %v906_v28 }
  0x8a   : > { %v1056_v34 = vor.u32 %v1055_v41, %v1052_v40  ;;  %v1173_v43 = vrot.slane %v2278_v3, 3 }
  0x8b   : > { %v1075_v24 = vsel %vm1031_vm5, %v1065_v60, %v1074_v18  ;;  %v939_v41 = vpack.c.b16 %v933_v32, %v933_v32 }
  0x8c   : > { %v1057_v48 = vsel %vm1031_vm5, %v1047_v25, %v1056_v34  ;;  %v1066_v4 = vsel %vm1031_vm5, %v1056_v34, %v1065_v60  ;;  %v1030_v25 = vpack.c.b16 %v1029_v19, %v1029_v19 }
  0x8e   : > { %v1175_v3 = vrot.slane %v1030_v25, 3 }
  0x90   : > { %1643 = vmatmul.msk.bf16.gmra.mxu1 %vm346_vm1, %v824_v31  ;;  %v1080_v31 = vshll.u32 %v1030_v25, 16 }
  0x91   : > { %1689 = vmatmul.msk.bf16.vlgmr.msra.gmra.mxu3 %vm346_vm1, %v1048_v30  ;;  %v1077_v30 = vshrl.u32 %v1030_v25, 16 }
  0x92   : > { %v1082_v40 = vrot.slane %v1080_v31, 3 }
  0x93   : > { %v1079_v39 = vrot.slane %v1077_v30, 2 }
  0x95   : > { %1626 = vmatmul.msk.bf16.gmra.mxu0 %vm346_vm1, %v732_v29  ;;  %1672 = vmatmul.msk.bf16.vlgmr.msra.gmra.mxu2 %vm346_vm1, %v942_v35  ;;  %v1758_v29 = vld [vmem:[#allocation2 + $0x8] sm:$0xff]  ;;  %v1083_v44 = vor.u32 %v1082_v40, %v1079_v39 }
  0x96   : > { %1318 = vmatpush.bf16.msra.mxu1 %v1758_v29 }
  0x9d   : > { %v427_v13 = vpop.f32.mrf.mxu1 }
  0xa1   : > { %1690 = vmatmul.msk.bf16.gmra.mxu3 %vm346_vm1, %v1057_v48 }
  0xa2   : > { %v371_v45 = vpop.f32.mrf.mxu0 }
  0xa3   : > { %v428_v33 = vadd.f32 %v427_v13, %v371_v45  ;;  %v1174_v45 = vsel %vm1165_vm6, %v1171_v17, %v1173_v43 }
  0xa4   : > { %v442_v53 = vpop.f32.mrf.mxu3 }
  0xa5   : > { %1706 = vmatmul.msk.bf16.vlgmr.msra.gmra.mxu0 %vm346_vm1, %v1168_v46  ;;  %1673 = vmatmul.msk.bf16.gmra.mxu2 %vm346_vm1, %v944_v50  ;;  %v429_v27 = vpop.f32.mrf.mxu1  ;;  %v949_v46 = vrot.slane %v939_v41, 2 }
  0xa7   : > { %v950_v57 = vsel %vm813_vm4, %v947_v20, %v949_v46 }
  0xa8   : > { %v386_v54 = vpop.f32.mrf.mxu2 }
  0xa9   : > { %v2267_v56 = vadd.f32 %v442_v53, %v386_v54  ;;  %v1084_v54 = vsel %vm1031_vm5, %v1074_v18, %v1083_v44 }
  0xaa   : > { %v2265_v55 = vpop.f32.mrf.mxu0 }
  0xab   : > { %v430_v48 = vadd.f32 %v429_v27, %v2265_v55 }
  0xac   : > { %v444_v62 = vpop.f32.mrf.mxu3 }
  0xad   : > { %v432_v34 = vpop.f32.mrf.mxu1 }
  0xb0   : > { %v388_v63 = vpop.f32.mrf.mxu2 }
  0xb1   : > { %v2274_v2 = vadd.f32 %v444_v62, %v388_v63  ;;  %1691 = vmatmul.msk.bf16.gmra.mxu3 %vm346_vm1, %v1066_v4 }
  0xb2   : > { %v2271_v0 = vpop.f32.mrf.mxu0 }
  0xb3   : > { %v433_v55 = vadd.f32 %v432_v34, %v2271_v0 }
  0xb4   : > { %v447_v10 = vpop.f32.mrf.mxu3 }
  0xb5   : > { %1707 = vmatmul.msk.bf16.gmra.mxu0 %vm346_vm1, %v1170_v1  ;;  %1674 = vmatmul.msk.bf16.gmra.mxu2 %vm346_vm1, %v946_v5  ;;  %v434_v59 = vpop.f32.mrf.mxu1 }
  0xb8   : > { %v391_v11 = vpop.f32.mrf.mxu2 }
  0xb9   : > { %v2288_v14 = vadd.f32 %v447_v10, %v391_v11  ;;  %v1176_v11 = vsel %vm1165_vm6, %v1173_v43, %v1175_v3 }
  0xba   : > { %v2286_v12 = vpop.f32.mrf.mxu0 }
  0xbb   : > { %v435_v5 = vadd.f32 %v434_v59, %v2286_v12 }
  0xbc   : > { %v449_v21 = vpop.f32.mrf.mxu3 }
  0xbd   : > { %v437_v0 = vpop.f32.mrf.mxu1 }
  0xc0   : > { %v393_v7 = vpop.f32.mrf.mxu2 }
  0xc1   : > { %v2294_v8 = vadd.f32 %v449_v21, %v393_v7  ;;  %1692 = vmatmul.msk.bf16.gmra.mxu3 %vm346_vm1, %v1075_v24  ;;  %v1757_v7 = vld [vmem:[#allocation2] sm:$0xff] }
  0xc2   : > { %v381_v22 = vpop.f32.mrf.mxu0  ;;  %1319 = vmatpush.bf16.msra.mxu1 %v1757_v7 }
  0xc3   : > { %v438_v16 = vadd.f32 %v437_v0, %v381_v22 }
  0xc4   : > { %v635_v35 = vpop.f32.mrf.mxu3 }
  0xc5   : > { %1708 = vmatmul.msk.bf16.gmra.mxu0 %vm346_vm1, %v1172_v23  ;;  %1675 = vmatmul.msk.bf16.gmra.mxu2 %vm346_vm1, %v948_v26  ;;  %v439_v23 = vpop.f32.mrf.mxu1 }
  0xc8   : > { %v509_v36 = vpop.f32.mrf.mxu2 }
  0xc9   : > { %v534_v38 = vadd.f32 %v509_v36, %v428_v33 }
  0xca   : > { %v383_v37 = vpop.f32.mrf.mxu0 }
  0xcb   : > { %v660_v42 = vadd.f32 %v635_v35, %v534_v38  ;;  %v440_v24 = vadd.f32 %v439_v23, %v383_v37 }
  0xcc   : > { %v637_v49 = vpop.f32.mrf.mxu3 }
  0xd0   : > { %v511_v50 = vpop.f32.mrf.mxu2 }
  0xd1   : > { %v535_v52 = vadd.f32 %v511_v50, %v430_v48  ;;  %1693 = vmatmul.msk.bf16.gmra.mxu3 %vm346_vm1, %v1084_v54 }
  0xd2   : > { %v769_v51 = vpop.f32.mrf.mxu0 }
  0xd3   : > { %v2305_v53 = vadd.f32 %v769_v51, %v660_v42  ;;  %v661_v58 = vadd.f32 %v637_v49, %v535_v52  ;;  %v861_v42 = vpop.f32.mrf.mxu1 }
  0xd4   : > { %v640_v60 = vpop.f32.mrf.mxu3 }
  0xd5   : > { %1709 = vmatmul.msk.bf16.gmra.mxu0 %vm346_vm1, %v1174_v45  ;;  %1676 = vmatmul.msk.bf16.gmra.mxu2 %vm346_vm1, %v950_v57 }
  0xd8   : > { %v514_v61 = vpop.f32.mrf.mxu2 }
  0xd9   : > { %v536_v63 = vadd.f32 %v514_v61, %v433_v55 }
  0xda   : > { %v771_v62 = vpop.f32.mrf.mxu0 }
  0xdb   : > { %v2313_v1 = vadd.f32 %v771_v62, %v661_v58  ;;  %v662_v4 = vadd.f32 %v640_v60, %v536_v63  ;;  %v863_v50 = vpop.f32.mrf.mxu1 }
  0xdc   : > { %v642_v6 = vpop.f32.mrf.mxu3 }
  0xe0   : > { %v516_v9 = vpop.f32.mrf.mxu2 }
  0xe1   : > { %v537_v13 = vadd.f32 %v516_v9, %v435_v5  ;;  %v887_v5 = vadd.f32 %v863_v50, %v2313_v1 }
  0xe2   : > { %v774_v10 = vpop.f32.mrf.mxu0 }
  0xe3   : > { %v2317_v15 = vadd.f32 %v774_v10, %v662_v4  ;;  %v663_v47 = vadd.f32 %v642_v6, %v537_v13  ;;  %v866_v58 = vpop.f32.mrf.mxu1 }
  0xe4   : > { %v645_v17 = vpop.f32.mrf.mxu3 }
  0xe5   : > { %1710 = vmatmul.msk.bf16.gmra.mxu0 %vm346_vm1, %v1176_v11  ;;  %v2343_v11 = vld [vmem:[%s2454_s2] ss:$0 sm:$0xff]  ;;  %v888_v1 = vadd.f32 %v866_v58, %v2317_v15 }
  0xe8   : > { %v519_v18 = vpop.f32.mrf.mxu2 }
  0xe9   : > { %v538_v20 = vadd.f32 %v519_v18, %v438_v16 }
  0xea   : > { %v776_v19 = vpop.f32.mrf.mxu0 }
  0xeb   : > { %v2320_v21 = vadd.f32 %v776_v19, %v663_v47  ;;  %v664_v12 = vadd.f32 %v645_v17, %v538_v20  ;;  %v868_v6 = vpop.f32.mrf.mxu1 }
  0xec   : > { %v647_v25 = vpop.f32.mrf.mxu3 }
  0xf0   : > { %v521_v26 = vpop.f32.mrf.mxu2 }
  0xf1   : > { %v539_v28 = vadd.f32 %v521_v26, %v440_v24 }
  0xf2   : > { %v779_v27 = vpop.f32.mrf.mxu0 }
  0xf3   : > { %v2322_v29 = vadd.f32 %v779_v27, %v664_v12  ;;  %v665_v30 = vadd.f32 %v647_v25, %v539_v28  ;;  %v871_v18 = vpop.f32.mrf.mxu1  ;;  %v889_v27 = vadd.f32 %v868_v6, %v2320_v21 }
  0xf4   : > { %v650_v31 = vpop.f32.mrf.mxu3 }
  0xf8   : > { %v524_v22 = vpop.f32.mrf.mxu2 }
  0xf9   : > { %v540_v33 = vadd.f32 %v524_v22, %v2267_v56 }
  0xfa   : > { %v781_v32 = vpop.f32.mrf.mxu0 }
  0xfb   : > { %v2325_v35 = vadd.f32 %v781_v32, %v665_v30  ;;  %v666_v36 = vadd.f32 %v650_v31, %v540_v33  ;;  %v873_v31 = vpop.f32.mrf.mxu1 }
  0xfc   : > { %v652_v38 = vpop.f32.mrf.mxu3 }
  0xfd   : > { %v891_v50 = vadd.f32 %v873_v31, %v2325_v35 }
 0x100   : > { %v526_v39 = vpop.f32.mrf.mxu2 }
 0x101   : > { %v541_v37 = vadd.f32 %v526_v39, %v2274_v2 }
 0x102   : > { %v784_v40 = vpop.f32.mrf.mxu0 }
 0x103   : > { %v2328_v41 = vadd.f32 %v784_v40, %v666_v36  ;;  %v667_v43 = vadd.f32 %v652_v38, %v541_v37  ;;  %v890_v37 = vadd.f32 %v871_v18, %v2322_v29  ;;  %v876_v21 = vpop.f32.mrf.mxu1 }
 0x104   : > { %v655_v34 = vpop.f32.mrf.mxu3 }
 0x108   : > { %v529_v44 = vpop.f32.mrf.mxu2 }
 0x109   : > { %v542_v48 = vadd.f32 %v529_v44, %v2288_v14  ;;  %v886_v14 = vadd.f32 %v861_v42, %v2305_v53 }
 0x10a   : > { %v786_v46 = vpop.f32.mrf.mxu0 }
 0x10b   : > { %v2331_v49 = vadd.f32 %v786_v46, %v667_v43  ;;  %v668_v56 = vadd.f32 %v655_v34, %v542_v48 }
 0x10c   : > { %v657_v51 = vpop.f32.mrf.mxu3 }
 0x110   : > { %v531_v45 = vpop.f32.mrf.mxu2 }
 0x111   : > { %v543_v54 = vadd.f32 %v531_v45, %v2294_v8 }
 0x112   : > { %v789_v52 = vpop.f32.mrf.mxu0 }
 0x113   : > { %v2334_v57 = vadd.f32 %v789_v52, %v668_v56  ;;  %v669_v2 = vadd.f32 %v657_v51, %v543_v54 }
 0x114   : > { %v1121_v55 = vpop.f32.mrf.mxu3 }
 0x118   : > { %v987_v59 = vpop.f32.mrf.mxu2 }
 0x119   : > { %v1012_v62 = vadd.f32 %v987_v59, %v886_v14 }
 0x11a   : > { %v791_v60 = vpop.f32.mrf.mxu0 }
 0x11b   : > { %v2336_v61 = vadd.f32 %v791_v60, %v669_v2  ;;  %v1146_v9 = vadd.f32 %v1121_v55, %v1012_v62  ;;  %v878_v60 = vpop.f32.mrf.mxu1  ;;  %v892_v62 = vadd.f32 %v876_v21, %v2328_v41 }
 0x11c   : > { %v1123_v63 = vpop.f32.mrf.mxu3 }
 0x120   : > { %v989_v4 = vpop.f32.mrf.mxu2 }
 0x121   : > { %v1013_v8 = vadd.f32 %v989_v4, %v887_v5 }
 0x122   : > { %v1213_v3 = vpop.f32.mrf.mxu0 }
 0x123   : > { %v1238_v10 = vadd.f32 %v1213_v3, %v1146_v9  ;;  %v1147_v13 = vadd.f32 %v1123_v63, %v1013_v8  ;;  %v893_v9 = vadd.f32 %v878_v60, %v2331_v49 }
 0x124   : > { %v1126_v0 = vpop.f32.mrf.mxu3 }
 0x125   : > { %v1252_v53 = vadd.f32 %v2343_v11, %v1238_v10 }
 0x127   : > { %v1262_v20 = vmax.f32 %v1252_v53, 0.0 }
 0x128   : > { %v992_v47 = vpop.f32.mrf.mxu2 }
 0x129   : > { %v1014_v7 = vadd.f32 %v992_v47, %v888_v1 }
 0x12a   : > { %v1215_v16 = vpop.f32.mrf.mxu0 }
 0x12b   : > { %v1239_v17 = vadd.f32 %v1215_v16, %v1147_v13  ;;  %v1148_v28 = vadd.f32 %v1126_v0, %v1014_v7  ;;  %v881_v0 = vpop.f32.mrf.mxu1 }
 0x12c   : > { %v1128_v24 = vpop.f32.mrf.mxu3  ;;  %v894_v41 = vadd.f32 %v881_v0, %v2334_v57 }
 0x12d   : > { %v1253_v19 = vadd.f32 %v2343_v11, %v1239_v17 }
 0x12f   : > { %v1263_v12 = vmax.f32 %v1253_v19, 0.0 }
 0x130   : > { %v994_v25 = vpop.f32.mrf.mxu2 }
 0x131   : > { %v1272_v23 = vpack.c.bf16 %v1263_v12, %v1262_v20  ;;  %v1015_v30 = vadd.f32 %v994_v25, %v889_v27 }
 0x132   : > { %v1218_v26 = vpop.f32.mrf.mxu0 }
 0x133   : > { %1719 = vmatmul.msk.bf16.vlgmr.msra.gmra.mxu1 %vm346_vm1, %v1272_v23  ;;  %v1240_v22 = vadd.f32 %v1218_v26, %v1148_v28  ;;  %v1149_v32 = vadd.f32 %v1128_v24, %v1015_v30  ;;  %v883_v23 = vpop.f32.mrf.mxu1 }
 0x134   : > { %v1131_v33 = vpop.f32.mrf.mxu3  ;;  %v895_v28 = vadd.f32 %v883_v23, %v2336_v61  ;;  %v2374_v61 = vld [vmem:[%s2456_s4] ss:$0 sm:$0xff] }
 0x135   : > { %v1254_v15 = vadd.f32 %v2343_v11, %v1240_v22 }
 0x137   : > { %v1264_v42 = vmax.f32 %v1254_v15, 0.0 }
 0x138   : > { %v997_v36 = vpop.f32.mrf.mxu2 }
 0x139   : > { %v1016_v34 = vadd.f32 %v997_v36, %v890_v37 }
 0x13a   : > { %v1220_v38 = vpop.f32.mrf.mxu0 }
 0x13b   : > { %v1241_v39 = vadd.f32 %v1220_v38, %v1149_v32  ;;  %v1150_v51 = vadd.f32 %v1131_v33, %v1016_v34 }
 0x13c   : > { %v1133_v44 = vpop.f32.mrf.mxu3 }
 0x13d   : > { %v1255_v40 = vadd.f32 %v2343_v11, %v1241_v39 }
 0x13f   : > { %v1265_v43 = vmax.f32 %v1255_v40, 0.0 }
 0x140   : > { %v999_v48 = vpop.f32.mrf.mxu2 }
 0x141   : > { %v1273_v46 = vpack.c.bf16 %v1265_v43, %v1264_v42  ;;  %v1017_v45 = vadd.f32 %v999_v48, %v891_v50 }
 0x142   : > { %v1223_v56 = vpop.f32.mrf.mxu0 }
 0x143   : > { %1720 = vmatmul.msk.bf16.gmra.mxu1 %vm346_vm1, %v1273_v46  ;;  %v1242_v52 = vadd.f32 %v1223_v56, %v1150_v51  ;;  %v1151_v54 = vadd.f32 %v1133_v44, %v1017_v45 }
 0x144   : > { %v1136_v2 = vpop.f32.mrf.mxu3 }
 0x145   : > { %v1256_v29 = vadd.f32 %v2343_v11, %v1242_v52 }
 0x147   : > { %v1266_v63 = vmax.f32 %v1256_v29, 0.0 }
 0x148   : > { %v1002_v58 = vpop.f32.mrf.mxu2 }
 0x149   : > { %v1018_v35 = vadd.f32 %v1002_v58, %v892_v62 }
 0x14a   : > { %v1225_v55 = vpop.f32.mrf.mxu0 }
 0x14b   : > { %v1243_v59 = vadd.f32 %v1225_v55, %v1151_v54  ;;  %v1152_v10 = vadd.f32 %v1136_v2, %v1018_v35 }
 0x14c   : > { %v1138_v8 = vpop.f32.mrf.mxu3 }
 0x14d   : > { %v1257_v14 = vadd.f32 %v2343_v11, %v1243_v59 }
 0x14f   : > { %v1267_v4 = vmax.f32 %v1257_v14, 0.0 }
 0x150   : > { %v1004_v5 = vpop.f32.mrf.mxu2 }
 0x151   : > { %v1274_v3 = vpack.c.bf16 %v1267_v4, %v1266_v63  ;;  %v1019_v13 = vadd.f32 %v1004_v5, %v893_v9 }
 0x152   : > { %v1228_v6 = vpop.f32.mrf.mxu0 }
 0x153   : > { %1721 = vmatmul.msk.bf16.gmra.mxu1 %vm346_vm1, %v1274_v3  ;;  %v1244_v47 = vadd.f32 %v1228_v6, %v1152_v10  ;;  %v1153_v16 = vadd.f32 %v1138_v8, %v1019_v13 }
 0x154   : > { %v1141_v12 = vpop.f32.mrf.mxu3 }
 0x155   : > { %v1258_v18 = vadd.f32 %v2343_v11, %v1244_v47 }
 0x157   : > { %v1268_v49 = vmax.f32 %v1258_v18, 0.0 }
 0x158   : > { %v1007_v53 = vpop.f32.mrf.mxu2 }
 0x159   : > { %v1020_v1 = vadd.f32 %v1007_v53, %v894_v41 }
 0x15a   : > { %v1230_v17 = vpop.f32.mrf.mxu0 }
 0x15b   : > { %v1245_v19 = vadd.f32 %v1230_v17, %v1153_v16  ;;  %v1154_v24 = vadd.f32 %v1141_v12, %v1020_v1 }
 0x15c   : > { %v1143_v22 = vpop.f32.mrf.mxu3 }
 0x15d   : > { %v1259_v20 = vadd.f32 %v2343_v11, %v1245_v19 }
 0x15f   : > { %v1269_v7 = vmax.f32 %v1259_v20, 0.0 }
 0x160   : > { %v1009_v26 = vpop.f32.mrf.mxu2 }
 0x161   : > { %v1275_v25 = vpack.c.bf16 %v1269_v7, %v1268_v49  ;;  %v1021_v57 = vadd.f32 %v1009_v26, %v895_v28 }
 0x162   : > { %v1233_v27 = vpop.f32.mrf.mxu0 }
 0x163   : > { %v1246_v30 = vadd.f32 %v1233_v27, %v1154_v24  ;;  %1722 = vmatmul.msk.bf16.gmra.mxu1 %vm346_vm1, %v1275_v25  ;;  %v1155_v32 = vadd.f32 %v1143_v22, %v1021_v57 }
 0x165   : > { %v1260_v31 = vadd.f32 %v2343_v11, %v1246_v30 }
 0x167   : > { %v1270_v15 = vmax.f32 %v1260_v31, 0.0 }
 0x16a   : > { %v1235_v33 = vpop.f32.mrf.mxu0 }
 0x16b   : > { %v1247_v36 = vadd.f32 %v1235_v33, %v1155_v32 }
 0x16d   : > { %v1261_v38 = vadd.f32 %v2343_v11, %v1247_v36 }
 0x16f   : > { %v1271_v39 = vmax.f32 %v1261_v38, 0.0 }
 0x171   : > { %v1276_v40 = vpack.c.bf16 %v1271_v39, %v1270_v15 }
 0x173   : > { %1723 = vmatmul.msk.bf16.gmra.mxu1 %vm346_vm1, %v1276_v40 }
 0x1b0   : > { %v1321_v37 = vpop.f32.mrf.mxu1 }
 0x1b1   : > { %v1322_v42 = vadd.f32 %v2374_v61, %v1321_v37 }
 0x1b3   : > { %1346 = vst [vmem:[%s2377_s12] sm:$0xff] %v1322_v42  ;;  %v1356_v11 = vsub.f32 0.0, %v1322_v42 }
 0x1b5   : > { %v1366_v43 = vmul.f32 1.442695, %v1356_v11 }
 0x1b7   : > { %1829 = vpow2.f32 %v1366_v43 }
 0x1b8   : > { %v1323_v21 = vpop.f32.mrf.mxu1 }
 0x1b9   : > { %v1324_v34 = vadd.f32 %v2374_v61, %v1323_v21 }
 0x1bb   : > { %1347 = vst [vmem:[%s2377_s12 + $0x8] sm:$0xff] %v1324_v34  ;;  %v1357_v44 = vsub.f32 0.0, %v1324_v34 }
 0x1bd   : > { %v1830_v46 = vpop.eup %1829  ;;  %v1368_v48 = vmul.f32 1.442695, %v1357_v44 }
 0x1be   : > { %v1386_v56 = vadd.f32 1.0, %v1830_v46 }
 0x1bf   : > { %1831 = vpow2.f32 %v1368_v48 }
 0x1c0   : > { %1833 = vrcp.f32 %v1386_v56  ;;  %v1326_v50 = vpop.f32.mrf.mxu1 }
 0x1c1   : > { %v1327_v51 = vadd.f32 %v2374_v61, %v1326_v50 }
 0x1c3   : > { %1348 = vst [vmem:[%s2377_s12 + $0x10] sm:$0xff] %v1327_v51  ;;  %v1358_v45 = vsub.f32 0.0, %v1327_v51 }
 0x1c5   : > { %v1832_v52 = vpop.eup %1831  ;;  %v1370_v54 = vmul.f32 1.442695, %v1358_v45 }
 0x1c6   : > { %v1834_v2 = vpop.eup %1833  ;;  %v1387_v58 = vadd.f32 1.0, %v1832_v52 }
 0x1c7   : > { %1407 = vst.msk [vmem:[%s2377_s12] sm:$0xff] %vm1406_vm7, %v1834_v2  ;;  %1835 = vpow2.f32 %v1370_v54 }
 0x1c8   : > { %1837 = vrcp.f32 %v1387_v58  ;;  %v1328_v55 = vpop.f32.mrf.mxu1 }
 0x1c9   : > { %v1329_v29 = vadd.f32 %v2374_v61, %v1328_v55 }
 0x1cb   : > { %1349 = vst [vmem:[%s2377_s12 + $0x18] sm:$0xff] %v1329_v29  ;;  %v1359_v59 = vsub.f32 0.0, %v1329_v29 }
 0x1cd   : > { %v1836_v60 = vpop.eup %1835  ;;  %v1372_v14 = vmul.f32 1.442695, %v1359_v59 }
 0x1ce   : > { %v1838_v62 = vpop.eup %1837  ;;  %v1388_v63 = vadd.f32 1.0, %v1836_v60 }
 0x1cf   : > { %1408 = vst.msk [vmem:[%s2377_s12 + $0x8] sm:$0xff] %vm1406_vm7, %v1838_v62  ;;  %1839 = vpow2.f32 %v1372_v14 }
 0x1d0   : > { %1841 = vrcp.f32 %v1388_v63  ;;  %v1331_v4 = vpop.f32.mrf.mxu1 }
 0x1d1   : > { %v1332_v35 = vadd.f32 %v2374_v61, %v1331_v4 }
 0x1d3   : > { %1350 = vst [vmem:[%s2377_s12 + $0x20] sm:$0xff] %v1332_v35  ;;  %v1360_v3 = vsub.f32 0.0, %v1332_v35 }
 0x1d5   : > { %v1840_v5 = vpop.eup %1839  ;;  %v1374_v6 = vmul.f32 1.442695, %v1360_v3 }
 0x1d6   : > { %v1842_v9 = vpop.eup %1841  ;;  %v1389_v8 = vadd.f32 1.0, %v1840_v5 }
 0x1d7   : > { %1409 = vst.msk [vmem:[%s2377_s12 + $0x10] sm:$0xff] %vm1406_vm7, %v1842_v9  ;;  %1843 = vpow2.f32 %v1374_v6 }
 0x1d8   : > { %1845 = vrcp.f32 %v1389_v8  ;;  %v1333_v10 = vpop.f32.mrf.mxu1 }
 0x1d9   : > { %v1334_v13 = vadd.f32 %v2374_v61, %v1333_v10 }
 0x1db   : > { %1351 = vst [vmem:[%s2377_s12 + $0x28] sm:$0xff] %v1334_v13  ;;  %v1361_v0 = vsub.f32 0.0, %v1334_v13 }
 0x1dd   : > { %v1844_v47 = vpop.eup %1843  ;;  %v1376_v16 = vmul.f32 1.442695, %v1361_v0 }
 0x1de   : > { %v1846_v53 = vpop.eup %1845  ;;  %v1390_v17 = vadd.f32 1.0, %v1844_v47 }
 0x1df   : > { %1410 = vst.msk [vmem:[%s2377_s12 + $0x18] sm:$0xff] %vm1406_vm7, %v1846_v53  ;;  %1847 = vpow2.f32 %v1376_v16 }
 0x1e0   : > { %1849 = vrcp.f32 %v1390_v17  ;;  %v1336_v41 = vpop.f32.mrf.mxu1 }
 0x1e1   : > { %v1337_v18 = vadd.f32 %v2374_v61, %v1336_v41 }
 0x1e3   : > { %1352 = vst [vmem:[%s2377_s12 + $0x30] sm:$0xff] %v1337_v18  ;;  %v1362_v19 = vsub.f32 0.0, %v1337_v18 }
 0x1e5   : > { %v1848_v1 = vpop.eup %1847  ;;  %v1378_v20 = vmul.f32 1.442695, %v1362_v19 }
 0x1e6   : > { %v1850_v12 = vpop.eup %1849  ;;  %v1391_v49 = vadd.f32 1.0, %v1848_v1 }
 0x1e7   : > { %1411 = vst.msk [vmem:[%s2377_s12 + $0x20] sm:$0xff] %vm1406_vm7, %v1850_v12  ;;  %1851 = vpow2.f32 %v1378_v20 }
 0x1e8   : > { %1853 = vrcp.f32 %v1391_v49  ;;  %v1338_v7 = vpop.f32.mrf.mxu1 }
 0x1e9   : > { %v1339_v23 = vadd.f32 %v2374_v61, %v1338_v7 }
 0x1eb   : > { %1353 = vst [vmem:[%s2377_s12 + $0x38] sm:$0xff] %v1339_v23  ;;  %v1363_v24 = vsub.f32 0.0, %v1339_v23 }
 0x1ed   : > { %v1852_v25 = vpop.eup %1851  ;;  %v1380_v26 = vmul.f32 1.442695, %v1363_v24 }
 0x1ee   : > { %v1854_v27 = vpop.eup %1853  ;;  %v1392_v28 = vadd.f32 1.0, %v1852_v25 }
 0x1ef   : > { %1412 = vst.msk [vmem:[%s2377_s12 + $0x28] sm:$0xff] %vm1406_vm7, %v1854_v27  ;;  %1855 = vpow2.f32 %v1380_v26 }
 0x1f0   : > { %1857 = vrcp.f32 %v1392_v28  ;;  %v1341_v30 = vpop.f32.mrf.mxu1 }
 0x1f1   : > { %v1342_v57 = vadd.f32 %v2374_v61, %v1341_v30 }
 0x1f3   : > { %1354 = vst [vmem:[%s2377_s12 + $0x40] sm:$0xff] %v1342_v57  ;;  %v1364_v31 = vsub.f32 0.0, %v1342_v57 }
 0x1f5   : > { %v1856_v22 = vpop.eup %1855  ;;  %v1382_v32 = vmul.f32 1.442695, %v1364_v31 }
 0x1f6   : > { %v1858_v33 = vpop.eup %1857  ;;  %v1393_v36 = vadd.f32 1.0, %v1856_v22 }
 0x1f7   : > { %1413 = vst.msk [vmem:[%s2377_s12 + $0x30] sm:$0xff] %vm1406_vm7, %v1858_v33  ;;  %1859 = vpow2.f32 %v1382_v32 }
 0x1f8   : > { %1861 = vrcp.f32 %v1393_v36  ;;  %v1343_v38 = vpop.f32.mrf.mxu1 }
 0x1f9   : > { %v1344_v15 = vadd.f32 %v2374_v61, %v1343_v38 }
 0x1fb   : > { %1355 = vst [vmem:[%s2377_s12 + $0x48] sm:$0xff] %v1344_v15  ;;  %v1365_v39 = vsub.f32 0.0, %v1344_v15 }
 0x1fd   : > { %v1860_v40 = vpop.eup %1859  ;;  %v1384_v37 = vmul.f32 1.442695, %v1365_v39 }
 0x1fe   : > { %v1862_v42 = vpop.eup %1861  ;;  %v1394_v11 = vadd.f32 1.0, %v1860_v40 }
 0x1ff   : > { %1414 = vst.msk [vmem:[%s2377_s12 + $0x38] sm:$0xff] %vm1406_vm7, %v1862_v42  ;;  %1863 = vpow2.f32 %v1384_v37 }
 0x200   : > { %1865 = vrcp.f32 %v1394_v11 }
 0x205   : > { %v1864_v43 = vpop.eup %1863 }
 0x206   : > { %v1866_v21 = vpop.eup %1865  ;;  %v1395_v34 = vadd.f32 1.0, %v1864_v43 }
 0x207   : > { %1415 = vst.msk [vmem:[%s2377_s12 + $0x40] sm:$0xff] %vm1406_vm7, %v1866_v21 }
 0x208   : > { %1867 = vrcp.f32 %v1395_v34 }
 0x20e   : > { %v1868_v61 = vpop.eup %1867 }
 0x20f   : > { %1416 = vst.msk [vmem:[%s2377_s12 + $0x48] sm:$0xff] %vm1406_vm7, %v1868_v61 }
 0x210   : > { %1926 = shalt.err (!%p1923_p8)
}
 0x211   : > { %s1970_s8 = smov 128   ;;  %s1971_s11 = smov 8  }
 0x212   : > { %1777 = dma.vmem_to_hbm [thread:$0]  (%p2040_p5), %s1431_s23, 1280, %s1433_s25, %s1418_s22, %s1970_s8, %s1970_s8, %s1971_s11  }
 0x213 PF: > { %p1789_p9 = scmp.ge.s32.totalorder %s1965_s21, 2  ;;  %s1447_s12 = sand.u32 1, %s1953_s18  }
 0x214   : > { %s1448_s13 = scalar_lea.sflag [#allocation4], %s1447_s12 }
 0x215   : > { %p1784_p10 = pnand %p1789_p9, %p2044_p6 }
 0x217   : > { %p1785_p11 = pneg %p1784_p10 }
 0x219   : > { %1948 = dma.done.wait (%p1785_p11), %s1448_s13, 1280  }
 0x21a   : > { %1950 = vsyncadd (%p1785_p11), %s1448_s13, 4294966016  ;;  %p16_p12 = scmp.ge.s32.totalorder %s2027_s24, 4   ;;  %s2460_s18 = smov %s1957_s19 }
 0x21b   : > { %s2461_s19 = smov %s1961_s20  ;;  %s2462_s20 = smov %s2038_s27 }
 0x21c   : > { %s2463_s21 = smov %s2027_s24  ;;  %18 = sbr.rel (!%p16_p12) target bundleno = 4 (0x4), region = 88 }
 0x221   :  { %1454 = vsyncpa [#allocation3], 1 }
 0x222   :  { %1456 = vsyncpa [#allocation3 + $0x1], 1 }
 0x223   :  { %1457 = vsyncpa [#allocation4], 1 }
 0x224   :  { %1459 = vsyncpa [#allocation4 + $0x1], 1 }

</bundles_post_ra>
